<compile_context>
chip_gen: v7x
topology: tpu7x:2x2x1
jax: 0.10.0
libtpu: 0.0.40
codegen_flags: <defaults>
</compile_context>

<pallas_src>
import functools
import math

import jax
import jax.numpy as jnp
from jax import lax
from jax.experimental import pallas as pl
from jax.experimental.pallas import tpu as pltpu


def _attn_pool_kernel(x_ref, w_ref, o_ref, m_sc, l_sc, acc_sc, *,
                      t_valid, t_chunk, needs_mask, precision):
    """One (batch-block, T-chunk) step of attention pooling with online softmax.

    x_ref : (Bblk, Tc, D)   input tile (input dtype)
    w_ref : (D, 1)          resident attention-weight column
    o_ref : (Bblk, D)       pooled output tile (written on the last T chunk)
    m_sc  : (Bblk, 1, 1) f32 running max
    l_sc  : (Bblk, 1, 1) f32 running sum of exp
    acc_sc: (Bblk, 1, D) f32 running un-normalised weighted sum
    """
    t_idx = pl.program_id(1)

    @pl.when(t_idx == 0)
    def _init():
        m_sc[...] = jnp.full_like(m_sc, -jnp.inf)
        l_sc[...] = jnp.zeros_like(l_sc)
        acc_sc[...] = jnp.zeros_like(acc_sc)

    xb = x_ref[...]                                  # (Bblk, Tc, D), input dtype
    blk, tc, d = xb.shape

    # Scores on the MXU with the contraction on xb's lane axis (no (Tc, D)
    # transpose): (Bblk*Tc, D) @ (D, 1) -> (Bblk*Tc, 1), f32 accumulation.
    s2 = jnp.dot(xb.reshape(blk * tc, d), w_ref[...],
                 preferred_element_type=jnp.float32, precision=precision)
    # Tiny relayout: score column -> lane-dense (Bblk, 1, Tc) row for the softmax.
    s = jnp.swapaxes(s2.reshape(blk, tc, 1), 1, 2)   # (Bblk, 1, Tc), f32

    if needs_mask:
        col = lax.broadcasted_iota(jnp.int32, s.shape, 2)
        s = jnp.where(t_idx * t_chunk + col < t_valid, s, -jnp.inf)

    # Online softmax update over T chunks; state kept in f32.
    m_prev = m_sc[...]
    m_new = jnp.maximum(m_prev, jnp.max(s, axis=-1, keepdims=True))
    alpha = jnp.exp(m_prev - m_new)                  # exactly 0 on the first chunk
    p = jnp.exp(s - m_new)                           # (Bblk, 1, Tc)
    l_sc[...] = alpha * l_sc[...] + jnp.sum(p, axis=-1, keepdims=True)
    acc_sc[...] = alpha * acc_sc[...] + jnp.einsum(
        "bst,btd->bsd", p.astype(xb.dtype), xb,
        preferred_element_type=jnp.float32, precision=precision)
    m_sc[...] = m_new

    @pl.when(t_idx == pl.num_programs(1) - 1)
    def _finalize():
        inv = pl.reciprocal(l_sc[...], approx=True)  # EUP slot, nearly free
        o_ref[...] = (acc_sc[...] * inv)[:, 0, :].astype(o_ref.dtype)


def _vmem_capacity_bytes():
    try:
        cap = getattr(pltpu.get_tpu_info(), "vmem_capacity_bytes", None)
        if cap:
            return int(cap)
    except Exception:
        pass
    return 64 * 1024 * 1024          # conservative (v7x-sized) fallback


def _round_down8(n):
    return max(8, (n // 8) * 8)


def attention_pool(x, w, b=None, *, block_b=64, block_t=None, precision=None):
    """AttentionPool forward.

    x: (B, T, D); w: (1, D) torch-style Linear weight; b: (1,) bias.
    The scalar bias is ignored inside the kernel: softmax over T is
    shift-invariant, so adding it to every score cannot change the output.
    Returns (B, D) in x.dtype.
    """
    del b  # mathematically a no-op for this module
    B, T, D = x.shape
    dtype = x.dtype
    itemsize = jnp.dtype(dtype).itemsize

    # ---------------- per-generation VMEM budget -------------------------
    vmem_cap = _vmem_capacity_bytes()               # 128 MiB v5e/v6e, 64 MiB v7x
    vmem_budget = vmem_cap * 3 // 4                 # ~96 MiB / ~48 MiB
    x_buf_budget = vmem_budget // 4                 # per buffer; 2 buffers <= 50%

    # ---------------- batch block (sublane-dense) ------------------------
    if B <= 8:
        blk = B                                      # full-array leading block
    else:
        blk = _round_down8(min(block_b, B))
        # keep >= 2 batch grid steps so megacore (v7x) can shard the batch axis
        if B >= 16 and pl.cdiv(B, blk) < 2:
            blk = _round_down8(B // 2)
        # shrink until a full-T tile fits; stop at 8 and chunk T instead
        while blk > 8 and blk * T * D * itemsize > x_buf_budget:
            blk = _round_down8(blk // 2)

    # ---------------- sequence (T) chunk ---------------------------------
    if block_t is not None:
        tc = min(max(1, block_t), T)
    elif blk * T * D * itemsize <= x_buf_budget:
        tc = T                                       # common case: no chunking
    else:
        budget_tc = x_buf_budget // max(1, blk * D * itemsize)
        tc_cap = max(8, (budget_tc // 8) * 8)
        tc_cap = min(tc_cap, ((T + 7) // 8) * 8)
        tc = None
        c = (min(tc_cap, T) // 8) * 8
        while c >= 8:                                # prefer a divisor of T
            if T % c == 0:
                tc = c
                break
            c -= 8
        if tc is None:
            tc = tc_cap                              # ragged chunk -> pad + mask

    # 8-align the T block: keeps the in-kernel (Bblk*Tc, D) view layout-free and
    # satisfies the (8,128) BlockSpec rule for chunked tiles.
    tc = ((tc + 7) // 8) * 8
    grid_t = pl.cdiv(T, tc)
    t_pad = grid_t * tc
    needs_mask = t_pad != T
    if needs_mask:
        # Only pad the sequence axis, and only when no clean chunk exists; the
        # padded scores are masked to -inf in-kernel so the softmax is unchanged.
        x = jnp.pad(x, ((0, 0), (0, t_pad - T), (0, 0)))

    grid_b = pl.cdiv(B, blk)                         # ragged last batch block OK

    w_col = jnp.asarray(w, dtype=dtype).reshape(D, 1)   # resident (D, 1) column

    kernel = functools.partial(
        _attn_pool_kernel,
        t_valid=T, t_chunk=tc, needs_mask=needs_mask, precision=precision)

    # ---------------- VMEM limit from actual tile math -------------------
    d_lane_pad = pl.cdiv(D, 128) * 128
    d_sub_pad = pl.cdiv(D, 8) * 8
    vmem_limit = (2 * blk * tc * D * itemsize        # double-buffered x tile
                  + 2 * blk * D * itemsize           # output tile
                  + 2 * d_sub_pad * 128 * itemsize   # (D, 1) weight, lane-padded
                  + blk * 8 * d_lane_pad * 4         # acc scratch (sublane-padded)
                  + 2 * blk * 8 * 128 * 4            # m / l scratch
                  + (8 << 20))                       # headroom
    vmem_limit = int(max(16 << 20, min(vmem_limit, vmem_cap * 9 // 10)))

    cost = pl.CostEstimate(
        flops=4 * B * t_pad * D,                     # two T*D contractions per row
        transcendentals=B * t_pad,                   # exp
        bytes_accessed=(B * t_pad * D + B * D + D) * itemsize)

    out = pl.pallas_call(
        kernel,
        out_shape=jax.ShapeDtypeStruct((B, D), dtype),
        grid_spec=pltpu.PrefetchScalarGridSpec(
            num_scalar_prefetch=0,
            grid=(grid_b, grid_t),
            in_specs=[
                pl.BlockSpec((blk, tc, D), lambda i, t: (i, t, 0)),
                pl.BlockSpec((D, 1), lambda i, t: (0, 0)),     # resident weight
            ],
            out_specs=pl.BlockSpec((blk, D), lambda i, t: (i, 0)),
            scratch_shapes=[
                pltpu.VMEM((blk, 1, 1), jnp.float32),   # running max
                pltpu.VMEM((blk, 1, 1), jnp.float32),   # running sum of exp
                pltpu.VMEM((blk, 1, D), jnp.float32),   # running weighted sum
            ]),
        compiler_params=pltpu.CompilerParams(
            dimension_semantics=("parallel", "arbitrary"),
            vmem_limit_bytes=vmem_limit),
        cost_estimate=cost,
    )(x, w_col)

    return out


def _reference(x, w, b):
    # Pure-JAX reference mirroring the PyTorch module (f32, high precision).
    xf = x.astype(jnp.float32)
    scores = jnp.einsum("btd,od->bto", xf, w.astype(jnp.float32),
                        precision=lax.Precision.HIGHEST) + b.astype(jnp.float32)
    weights = jax.nn.softmax(scores, axis=1)
    return jnp.sum(weights * xf, axis=1)


if __name__ == "__main__":
    # ---- 1) module-sized check (B=2, T=8, D=32): tight check at HIGHEST ----
    B, T, D = 2, 8, 32
    kx, kw, kb = jax.random.split(jax.random.PRNGKey(0), 3)
    x = jax.random.normal(kx, (B, T, D), dtype=jnp.float32)
    bound = 1.0 / math.sqrt(D)
    w = jax.random.uniform(kw, (1, D), jnp.float32, -bound, bound)
    b = jax.random.uniform(kb, (1,), jnp.float32, -bound, bound)

    ref = _reference(x, w, b)

    out = jax.block_until_ready(
        attention_pool(x, w, b, precision=lax.Precision.HIGHEST))
    assert out.shape == (B, D)
    assert jnp.allclose(out, ref, atol=5e-3, rtol=5e-3), \
        float(jnp.max(jnp.abs(out - ref)))

    # Production-default precision path (DEFAULT on the MXU) also compiles.
    out_d = jax.block_until_ready(attention_pool(x, w, b))
    assert jnp.allclose(out_d, ref, atol=3e-2, rtol=3e-2), \
        float(jnp.max(jnp.abs(out_d - ref)))

    # ---- 2) force the T-chunked online-softmax path + ragged batch block ---
    B2, T2, D2 = 20, 40, 128
    k1, k2, k3 = jax.random.split(jax.random.PRNGKey(1), 3)
    x2 = jax.random.normal(k1, (B2, T2, D2), dtype=jnp.float32)
    bound2 = 1.0 / math.sqrt(D2)
    w2 = jax.random.uniform(k2, (1, D2), jnp.float32, -bound2, bound2)
    b2 = jax.random.uniform(k3, (1,), jnp.float32, -1.0, 1.0)

    out2 = jax.block_until_ready(
        attention_pool(x2, w2, b2, block_b=8, block_t=16,
                       precision=lax.Precision.HIGHEST))
    ref2 = _reference(x2, w2, b2)
    assert out2.shape == (B2, D2)
    assert jnp.allclose(out2, ref2, atol=5e-3, rtol=5e-3), \
        float(jnp.max(jnp.abs(out2 - ref2)))

    print("KERNEL_OK")
</pallas_src>

<mosaic_0001>
module attributes {stable_mosaic.version = 11 : i64} {
  func.func @_attn_pool_kernel(%arg0: i32, %arg1: i32, %arg2: memref<2x8x32xf32, #tpu.memory_space<vmem>>, %arg3: memref<32x1xf32, #tpu.memory_space<vmem>>, %arg4: memref<2x32xf32, #tpu.memory_space<vmem>>, %arg5: memref<2x1x1xf32, #tpu.memory_space<vmem>>, %arg6: memref<2x1x1xf32, #tpu.memory_space<vmem>>, %arg7: memref<2x1x32xf32, #tpu.memory_space<vmem>>) attributes {dimension_semantics = [#tpu.dimension_semantics<parallel>, #tpu.dimension_semantics<arbitrary>], iteration_bounds = array<i64: 1, 1>, scalar_prefetch = 0 : i64, scratch_operands = 3 : i64, tpu.core_type = #tpu.core_type<tc>, window_params = [{transform_indices = @transform_0, window_bounds = array<i64: 2, 8, 32>}, {pipeline_mode = #tpu.pipeline_mode<synchronous>, transform_indices = @transform_1, window_bounds = array<i64: 32, 1>}, {transform_indices = @transform_2, window_bounds = array<i64: 2, 32>}]} {
    %c0_i32 = arith.constant 0 : i32
    %0 = arith.cmpi eq, %arg1, %c0_i32 : i32
    %1 = arith.extui %0 : i1 to i32
    %c0_i32_0 = arith.constant 0 : i32
    %2 = arith.cmpi ne, %1, %c0_i32_0 : i32
    scf.if %2 {
      %cst_28 = arith.constant 0xFF800000 : f32
      %34 = vector.broadcast %cst_28 : f32 to vector<2x1x1xf32>
      %c0_29 = arith.constant 0 : index
      %c0_30 = arith.constant 0 : index
      %c0_31 = arith.constant 0 : index
      %35 = vector.load %arg5[%c0_29, %c0_30, %c0_31] : memref<2x1x1xf32, #tpu.memory_space<vmem>>, vector<2x1x1xf32>
      tpu.vector_store %arg5[%c0_29, %c0_30, %c0_31], %34 {strides = array<i32>} : memref<2x1x1xf32, #tpu.memory_space<vmem>>, vector<2x1x1xf32>,
      %cst_32 = arith.constant 0.000000e+00 : f32
      %36 = vector.broadcast %cst_32 : f32 to vector<2x1x1xf32>
      %c0_33 = arith.constant 0 : index
      %c0_34 = arith.constant 0 : index
      %c0_35 = arith.constant 0 : index
      %37 = vector.load %arg6[%c0_33, %c0_34, %c0_35] : memref<2x1x1xf32, #tpu.memory_space<vmem>>, vector<2x1x1xf32>
      tpu.vector_store %arg6[%c0_33, %c0_34, %c0_35], %36 {strides = array<i32>} : memref<2x1x1xf32, #tpu.memory_space<vmem>>, vector<2x1x1xf32>,
      %cst_36 = arith.constant 0.000000e+00 : f32
      %38 = vector.broadcast %cst_36 : f32 to vector<2x1x32xf32>
      %c0_37 = arith.constant 0 : index
      %c0_38 = arith.constant 0 : index
      %c0_39 = arith.constant 0 : index
      %39 = vector.load %arg7[%c0_37, %c0_38, %c0_39] : memref<2x1x32xf32, #tpu.memory_space<vmem>>, vector<2x1x32xf32>
      tpu.vector_store %arg7[%c0_37, %c0_38, %c0_39], %38 {strides = array<i32>} : memref<2x1x32xf32, #tpu.memory_space<vmem>>, vector<2x1x32xf32>,
    } else {
    }
    %c0 = arith.constant 0 : index
    %c0_1 = arith.constant 0 : index
    %c0_2 = arith.constant 0 : index
    %3 = vector.load %arg2[%c0, %c0_1, %c0_2] : memref<2x8x32xf32, #tpu.memory_space<vmem>>, vector<2x8x32xf32>
    %4 = vector.shape_cast %3 : vector<2x8x32xf32> to vector<16x32xf32>
    %c0_3 = arith.constant 0 : index
    %c0_4 = arith.constant 0 : index
    %5 = vector.load %arg3[%c0_3, %c0_4] : memref<32x1xf32, #tpu.memory_space<vmem>>, vector<32x1xf32>
    %cst = arith.constant dense<0.000000e+00> : vector<16x1xf32>
    %6 = tpu.matmul %4, %5, %cst {dimension_numbers = #tpu.dot_dimension_numbers<[1], [0], [0], [1], [0, 0, 1, 1], [], []>, precision = #tpu.contract_precision<fp32>} : vector<16x32xf32>, vector<32x1xf32>, vector<16x1xf32> -> vector<16x1xf32>
    %7 = vector.shape_cast %6 : vector<16x1xf32> to vector<2x8x1xf32>
    %8 = tpu.transpose %7, [0, 2, 1] : vector<2x8x1xf32> -> vector<2x1x8xf32>
    %c0_5 = arith.constant 0 : index
    %c0_6 = arith.constant 0 : index
    %c0_7 = arith.constant 0 : index
    %9 = vector.load %arg5[%c0_5, %c0_6, %c0_7] : memref<2x1x1xf32, #tpu.memory_space<vmem>>, vector<2x1x1xf32>
    %cst_8 = arith.constant dense<0xFF800000> : vector<2x1xf32>
    %10 = vector.multi_reduction <maximumf>, %8, %cst_8 [2] : vector<2x1x8xf32> to vector<2x1xf32>
    %11 = vector.shape_cast %10 : vector<2x1xf32> to vector<2x1x1xf32>
    %12 = arith.maximumf %9, %11 : vector<2x1x1xf32>
    %13 = arith.subf %9, %12 : vector<2x1x1xf32>
    %14 = math.exp %13 : vector<2x1x1xf32>
    %15 = vector.broadcast %12 : vector<2x1x1xf32> to vector<2x1x8xf32>
    %16 = arith.subf %8, %15 : vector<2x1x8xf32>
    %17 = math.exp %16 : vector<2x1x8xf32>
    %c0_9 = arith.constant 0 : index
    %c0_10 = arith.constant 0 : index
    %c0_11 = arith.constant 0 : index
    %18 = vector.load %arg6[%c0_9, %c0_10, %c0_11] : memref<2x1x1xf32, #tpu.memory_space<vmem>>, vector<2x1x1xf32>
    %19 = arith.mulf %14, %18 : vector<2x1x1xf32>
    %cst_12 = arith.constant dense<0.000000e+00> : vector<2x1xf32>
    %20 = vector.multi_reduction <add>, %17, %cst_12 [2] : vector<2x1x8xf32> to vector<2x1xf32>
    %21 = vector.shape_cast %20 : vector<2x1xf32> to vector<2x1x1xf32>
    %22 = arith.addf %19, %21 : vector<2x1x1xf32>
    %c0_13 = arith.constant 0 : index
    %c0_14 = arith.constant 0 : index
    %c0_15 = arith.constant 0 : index
    %23 = vector.load %arg6[%c0_13, %c0_14, %c0_15] : memref<2x1x1xf32, #tpu.memory_space<vmem>>, vector<2x1x1xf32>
    tpu.vector_store %arg6[%c0_13, %c0_14, %c0_15], %22 {strides = array<i32>} : memref<2x1x1xf32, #tpu.memory_space<vmem>>, vector<2x1x1xf32>,
    %c0_16 = arith.constant 0 : index
    %c0_17 = arith.constant 0 : index
    %c0_18 = arith.constant 0 : index
    %24 = vector.load %arg7[%c0_16, %c0_17, %c0_18] : memref<2x1x32xf32, #tpu.memory_space<vmem>>, vector<2x1x32xf32>
    %25 = vector.broadcast %14 : vector<2x1x1xf32> to vector<2x1x32xf32>
    %26 = arith.mulf %25, %24 : vector<2x1x32xf32>
    "tpu.trace_start"() <{level = 10 : i32, message = "bst,btd->bsd"}> : () -> ()
    %cst_19 = arith.constant dense<0.000000e+00> : vector<2x1x32xf32>
    %27 = tpu.matmul %17, %3, %cst_19 {dimension_numbers = #tpu.dot_dimension_numbers<[2], [1], [1], [2], [0, 0, 0, 1, 1, 2], [0], [0]>, precision = #tpu.contract_precision<fp32>} : vector<2x1x8xf32>, vector<2x8x32xf32>, vector<2x1x32xf32> -> vector<2x1x32xf32>
    "tpu.trace_stop"() : () -> ()
    %28 = arith.addf %26, %27 : vector<2x1x32xf32>
    %c0_20 = arith.constant 0 : index
    %c0_21 = arith.constant 0 : index
    %c0_22 = arith.constant 0 : index
    %29 = vector.load %arg7[%c0_20, %c0_21, %c0_22] : memref<2x1x32xf32, #tpu.memory_space<vmem>>, vector<2x1x32xf32>
    tpu.vector_store %arg7[%c0_20, %c0_21, %c0_22], %28 {strides = array<i32>} : memref<2x1x32xf32, #tpu.memory_space<vmem>>, vector<2x1x32xf32>,
    %c0_23 = arith.constant 0 : index
    %c0_24 = arith.constant 0 : index
    %c0_25 = arith.constant 0 : index
    %30 = vector.load %arg5[%c0_23, %c0_24, %c0_25] : memref<2x1x1xf32, #tpu.memory_space<vmem>>, vector<2x1x1xf32>
    tpu.vector_store %arg5[%c0_23, %c0_24, %c0_25], %12 {strides = array<i32>} : memref<2x1x1xf32, #tpu.memory_space<vmem>>, vector<2x1x1xf32>,
    %c0_i32_26 = arith.constant 0 : i32
    %31 = arith.cmpi eq, %arg1, %c0_i32_26 : i32
    %32 = arith.extui %31 : i1 to i32
    %c0_i32_27 = arith.constant 0 : i32
    %33 = arith.cmpi ne, %32, %c0_i32_27 : i32
    scf.if %33 {
      %c0_28 = arith.constant 0 : index
      %c0_29 = arith.constant 0 : index
      %c0_30 = arith.constant 0 : index
      %34 = vector.load %arg6[%c0_28, %c0_29, %c0_30] : memref<2x1x1xf32, #tpu.memory_space<vmem>>, vector<2x1x1xf32>
      %35 = tpu.reciprocal %34 {approx = true} : vector<2x1x1xf32> -> vector<2x1x1xf32>
      %c0_31 = arith.constant 0 : index
      %c0_32 = arith.constant 0 : index
      %c0_33 = arith.constant 0 : index
      %36 = vector.load %arg7[%c0_31, %c0_32, %c0_33] : memref<2x1x32xf32, #tpu.memory_space<vmem>>, vector<2x1x32xf32>
      %37 = vector.broadcast %35 : vector<2x1x1xf32> to vector<2x1x32xf32>
      %38 = arith.mulf %36, %37 : vector<2x1x32xf32>
      %39 = vector.shape_cast %38 : vector<2x1x32xf32> to vector<2x32xf32>
      %c0_34 = arith.constant 0 : index
      %c0_35 = arith.constant 0 : index
      %40 = vector.load %arg4[%c0_34, %c0_35] : memref<2x32xf32, #tpu.memory_space<vmem>>, vector<2x32xf32>
      tpu.vector_store %arg4[%c0_34, %c0_35], %39 {strides = array<i32>} : memref<2x32xf32, #tpu.memory_space<vmem>>, vector<2x32xf32>,
    } else {
    }
    return
  }
  func.func @transform_0(%arg0: i32, %arg1: i32) -> (i32, i32, i32) {
    %c0_i32 = arith.constant 0 : i32
    %c0_i32_0 = arith.constant 0 : i32
    return %arg0, %arg1, %c0_i32 : i32, i32, i32
  }
  func.func @transform_1(%arg0: i32, %arg1: i32) -> (i32, i32) {
    %c0_i32 = arith.constant 0 : i32
    %c0_i32_0 = arith.constant 0 : i32
    %c0_i32_1 = arith.constant 0 : i32
    return %c0_i32, %c0_i32_0 : i32, i32
  }
  func.func @transform_2(%arg0: i32, %arg1: i32) -> (i32, i32) {
    %c0_i32 = arith.constant 0 : i32
    %c0_i32_0 = arith.constant 0 : i32
    return %arg0, %c0_i32 : i32, i32
  }
}

</mosaic_0001>

<bundles_post_ra>
// kernel: tpu_custom_call.1
= control target key start
LH: loop header
LB: loop body
LE: loop exit
PB: predicated region body
PF: predicated region fallthrough
CT: control target
= control target key end

     0   :  { %vm30_vm0 = vcmask 261120   ;;  %s2129_s0 = inlined_call_operand.vmem [shape: f32[2,8,32], index: 0, kind: input, shape index: {}]   ;;  %s2130_s1 = inlined_call_operand.vmem [shape: f32[32,1], index: 1, kind: input, shape index: {}]   ;;  %s2131_s2 = inlined_call_operand.hbm [shape: f32[2,32], index: 2, kind: output, shape index: {}]  }
   0x1   :  { %v26_v0 = vld [vmem:[%s2130_s1] sm:$0xff]  ;;  %v27_v1 = vld [vmem:[%s2130_s1 + $0x8] sm:$0xff]  ;;  %v28_v2 = vld [vmem:[%s2130_s1 + $0x10] sm:$0xff] }
   0x2   :  { %v38_v3 = vand.u32 4294901760, %v26_v0  ;;  %v41_v4 = vand.u32 4294901760, %v27_v1  ;;  %v29_v5 = vld [vmem:[%s2130_s1 + $0x18] sm:$0xff]  ;;  %v44_v6 = vand.u32 4294901760, %v28_v2  ;;  %v2000_v7 = vld [vmem:[%s2129_s0] sm:$0xff]  ;;  %v2005_v8 = vld [vmem:[%s2129_s0 + $0x8] sm:$0xff] }
   0x3   :  { %v47_v9 = vand.u32 4294901760, %v29_v5  ;;  %v32_v10 = vsel %vm30_vm0, %v2000_v7, 0  ;;  %v35_v11 = vsel %vm30_vm0, %v2005_v8, 0 }
   0x4   :  { %7 = vsyncpa [#allocation6], 0  ;;  %v2009_v12 = vpack.c.bf16 %v41_v4, %v38_v3  ;;  %v2011_v13 = vand.u32 4294901760, %v32_v10  ;;  %v2013_v14 = vand.u32 4294901760, %v35_v11  ;;  %v128_v15 = vsub.f32 %v26_v0, %v38_v3  ;;  %s1969_s0 = smov [#allocation5]  }
   0x5   :  { %v2015_v16 = vpack.c.bf16 %v47_v9, %v44_v6  ;;  %v135_v17 = vsub.f32 %v27_v1, %v41_v4  ;;  %v142_v18 = vsub.f32 %v28_v2, %v44_v6  ;;  %v149_v19 = vsub.f32 %v29_v5, %v47_v9  ;;  %s1668_s1 = sshll.u32 %s1969_s0, 4  ;;  %s1669_s1 = int_to_ptr.vmem [resolvable:$true] %s1668_s1 }
   0x6   :  { %1863 = vmatprep.subr.bf16.mxu0 %v2009_v12  ;;  %v107_v20 = vsub.f32 %v32_v10, %v2011_v13  ;;  %v117_v21 = vsub.f32 %v35_v11, %v2013_v14  ;;  %v129_v22 = vand.u32 4294901760, %v128_v15  ;;  %vm631_vm1 = vcmask 57344   ;;  %s1940_s21 = scalar_lea.vmem %s1669_s1, 32  ;;  %p1945_p1 = scmp.lt.s32.totalorder %s1669_s1, %s1669_s1 }
   0x7   :  { %1865 = vmatpush3.bf16.msra.mxu0 %v2009_v12  ;;  %v136_v23 = vand.u32 4294901760, %v135_v17  ;;  %v143_v24 = vand.u32 4294901760, %v142_v18  ;;  %v150_v25 = vand.u32 4294901760, %v149_v19  ;;  %v1878_v42 = vpack.c.bf16 %v135_v17, %v128_v15  ;;  %p1941_p0 = scmp.ne.s32.totalorder %s1669_s1, %s1940_s21  ;;  %p1946_p2 = scmp.lt.s32.totalorder %s1940_s21, %s1940_s21 }
   0x8   :  { %1867 = vmatprep.subr.bf16.mxu0 %v2015_v16  ;;  %v108_v26 = vand.u32 4294901760, %v107_v20  ;;  %v118_v27 = vand.u32 4294901760, %v117_v21  ;;  %v130_v28 = vsub.f32 %v128_v15, %v129_v22  ;;  %v1882_v43 = vpack.c.bf16 %v149_v19, %v142_v18 }
   0x9   :  { %v137_v29 = vsub.f32 %v135_v17, %v136_v23  ;;  %v144_v30 = vsub.f32 %v142_v18, %v143_v24  ;;  %v151_v31 = vsub.f32 %v149_v19, %v150_v25  ;;  %v1894_v44 = vpack.c.bf16 %v136_v23, %v129_v22  ;;  %p1947_p3 = por %p1946_p2, %p1945_p1 }
   0xa   :  { %v109_v32 = vsub.f32 %v107_v20, %v108_v26  ;;  %v119_v33 = vsub.f32 %v117_v21, %v118_v27  ;;  %v131_v34 = vand.u32 4294901760, %v130_v28  ;;  %v1898_v45 = vpack.c.bf16 %v150_v25, %v143_v24 }
   0xb   :  { %1869 = vmatpush3.bf16.msra.mxu0 %v2015_v16  ;;  %v138_v35 = vand.u32 4294901760, %v137_v29  ;;  %v145_v36 = vand.u32 4294901760, %v144_v30  ;;  %v152_v37 = vand.u32 4294901760, %v151_v31  ;;  %vm16_vm2 = vcmask 0   ;;  %p1948_p4 = pnand %p1947_p3, %p1941_p0 }
   0xc   :  { %v110_v38 = vand.u32 4294901760, %v109_v32  ;;  %v120_v39 = vand.u32 4294901760, %v119_v33  ;;  %v1964_v52 = vmov -inf   ;;  %v1965_v53 = vmov 0  }
   0xd   :  { %v1870_v40 = vpack.c.bf16 %v138_v35, %v131_v34  ;;  %v1874_v41 = vpack.c.bf16 %v152_v37, %v145_v36  ;;  %17 = vst.msk [vmem:[#allocation2] sm:$0x1] %vm16_vm2, %v1964_v52  ;;  %18 = vst.msk [vmem:[#allocation2 + $0x1] sm:$0x1] %vm16_vm2, %v1964_v52  ;;  %1927 = vset.pattern.permute.xlu1 %v1965_v53  ;;  %v1966_v54 = vmov 0.0   ;;  %v2049_v63 = vand.u32 4294901760, %v2000_v7 }
   0xe   :  { %1744 = vmatprep.mubr.f32.mxu0 %v110_v38  ;;  %1802 = vmatprep.subr.mxu1 %v1966_v54  ;;  %19 = vst.msk [vmem:[#allocation3] sm:$0x1] %vm16_vm2, %v1966_v54  ;;  %20 = vst.msk [vmem:[#allocation3 + $0x1] sm:$0x1] %vm16_vm2, %v1966_v54  ;;  %vm1967_vm3 = vmmov 0   ;;  %v651_v0 = vlaneseq  ;;  %vm707_vm4 = vcmask 64512  }
   0xf   :  { %1745 = vmatmul.mubr.f32.vlgmr.msra.gmra.mrb[0].mxu0 %v120_v39  ;;  %1871 = vmatprep.subr.bf16.mxu0 %v1870_v40  ;;  %vm21_vm5 = vcmask 253952   ;;  %v1161_v29 = vand.u32 4294901760, %v2005_v8  ;;  %vm1660_vm6 = vcmask 254976  }
  0x10   :  { %1873 = vmatpush3.bf16.msra.mxu0 %v1870_v40  ;;  %1755 = vmatprep.mubr.f32.mxu0 %v2011_v13  ;;  %v2055_v1 = vshrl.u32 %v651_v0, 7  ;;  %22 = vst.msk [vmem:[#allocation4] sm:$0x1] %vm21_vm5, %v1966_v54  ;;  %23 = vst.msk [vmem:[#allocation4 + $0x1] sm:$0x1] %vm21_vm5, %v1966_v54 }
  0x11   :  { %1875 = vmatprep.subr.bf16.mxu0 %v1874_v41  ;;  %1803 = vmatpush3.msra.mxu1 %v2049_v63  ;;  %v1238_v32 = vsub.f32 %v2005_v8, %v1161_v29 }
  0x12   :  { %1804 = vmatprep.mubr.msk.f32.mxu1 %vm1967_vm3, %v1966_v54  ;;  %1807 = vmatprep.subr.mxu1 %v1966_v54  ;;  %v2058_v2 = vsub.s32 0, %v2055_v1 }
  0x13   :  { %v1239_v35 = vand.u32 4294901760, %v1238_v32 }
  0x14   :  { %1877 = vmatpush3.bf16.msra.mxu0 %v1874_v41  ;;  %v629_v55 = vld [vmem:[#allocation2] sm:$0x1]  ;;  %v630_v58 = vld [vmem:[#allocation2 + $0x1] sm:$0x1] }
  0x15   :  { %1879 = vmatprep.subr.bf16.mxu0 %v1878_v42  ;;  %v1240_v8 = vsub.f32 %v1238_v32, %v1239_v35  ;;  %v670_v40 = vld [vmem:[#allocation3] sm:$0x1] }
  0x17   :  { %1756 = vmatmul.mubr.f32.vlgmr.msra.gmra.mrb[0].mxu0 %v2013_v14  ;;  %v1241_v38 = vand.u32 4294901760, %v1240_v8 }
  0x18   :  { %1881 = vmatpush3.bf16.msra.mxu0 %v1878_v42  ;;  %1766 = vmatprep.mubr.f32.mxu0 %v107_v20 }
  0x19   :  { %1883 = vmatprep.subr.bf16.mxu0 %v1882_v43 }
  0x1c   :  { %1885 = vmatpush3.bf16.msra.mxu0 %v1882_v43  ;;  %v671_v43 = vld [vmem:[#allocation3 + $0x1] sm:$0x1] }
  0x1d   :  { %1887 = vmatprep.subr.bf16.mxu0 %v2009_v12 }
  0x1f   :  { %1767 = vmatmul.mubr.f32.vlgmr.msra.gmra.mrb[0].mxu0 %v117_v21 }
  0x20   :  { %1889 = vmatpush3.bf16.msra.mxu0 %v2009_v12  ;;  %1777 = vmatprep.mubr.f32.mxu0 %v108_v26 }
  0x21   :  { %1891 = vmatprep.subr.bf16.mxu0 %v2015_v16 }
  0x24   :  { %1893 = vmatpush3.bf16.msra.mxu0 %v2015_v16 }
  0x25   :  { %1895 = vmatprep.subr.bf16.mxu0 %v1894_v44 }
  0x27   :  { %1778 = vmatmul.mubr.f32.vlgmr.msra.gmra.mrb[0].mxu0 %v118_v27 }
  0x28   :  { %1897 = vmatpush3.bf16.msra.mxu0 %v1894_v44  ;;  %1788 = vmatprep.mubr.f32.mxu0 %v2011_v13 }
  0x29   :  { %1899 = vmatprep.subr.bf16.mxu0 %v1898_v45 }
  0x2c   :  { %1901 = vmatpush3.bf16.msra.mxu0 %v1898_v45 }
  0x2d   :  { %1903 = vmatprep.subr.bf16.mxu0 %v2009_v12 }
  0x2f   :  { %1789 = vmatmul.mubr.f32.vlgmr.msra.gmra.mrb[0].mxu0 %v2013_v14 }
  0x30   :  { %1905 = vmatpush3.bf16.msra.mxu0 %v2009_v12  ;;  %1799 = vmatprep.mubr.f32.mxu0 %v2011_v13  ;;  %v789_v13 = vsub.f32 %v2000_v7, %v2049_v63 }
  0x31   :  { %1907 = vmatprep.subr.bf16.mxu0 %v2015_v16 }
  0x32   :  { %v790_v17 = vand.u32 4294901760, %v789_v13 }
  0x34   :  { %1909 = vmatpush3.bf16.msra.mxu0 %v2015_v16  ;;  %v791_v23 = vsub.f32 %v789_v13, %v790_v17 }
  0x36   :  { %v792_v26 = vand.u32 4294901760, %v791_v23 }
  0x37   :  { %1800 = vmatmul.mubr.f32.vlgmr.msra.gmra.mrb[0].mxu0 %v2013_v14 }
 0x10a   :  { %v1801_v46 = vpop.f32.mrb[0].mxu0 }
 0x10b   :  { %v555_v47 = vpop.f32.mrb[1].mxu0 }
 0x10c   :  { %565 = vxpose.xlu0.b32.start.end [1/1] (short) (narrow) %v555_v47, 8 }
 0x110   :  { %597 = vxpose.xlu0.b32.start.end [1/1] (short) (narrow) %v1801_v46, 8 }
 0x139   :  { %1926 = vset.pattern.permute.xlu0 %v1965_v53 }
 0x18c   :  { %v581_v48 = vpop.trf.xlu0 }
 0x18d   :  { %v632_v49 = vsel %vm631_vm1, %v581_v48, -inf }
 0x18e   :  { %633 = vmax.xlane.f32.xlu1 %v632_v49 }
 0x190   :  { %v613_v50 = vpop.trf.xlu0 }
 0x191   :  { %v635_v51 = vsel %vm631_vm1, %v613_v50, -inf }
 0x192   :  { %636 = vmax.xlane.f32.xlu1 %v635_v51 }
 0x21b   :  { %v634_v56 = vpop.xlane.xlu1 %633 }
 0x21c   :  { %v638_v57 = vmax.f32 %v629_v55, %v634_v56 }
 0x21e   :  { %v640_v59 = vsub.f32 %v629_v55, %v638_v57  ;;  %1611 = vst.msk [vmem:[#allocation2] sm:$0x1] %vm16_vm2, %v638_v57  ;;  %648 = vperm.xlu0 %1926, %v638_v57  }
 0x21f   :  { %v637_v60 = vpop.xlane.xlu1 %636 }
 0x220   :  { %v639_v61 = vmax.f32 %v630_v58, %v637_v60  ;;  %v642_v20 = vmul.f32 1.442695, %v640_v59 }
 0x222   :  { %v641_v62 = vsub.f32 %v630_v58, %v639_v61  ;;  %1612 = vst.msk [vmem:[#allocation2 + $0x1] sm:$0x1] %vm16_vm2, %v639_v61  ;;  %657 = vperm.xlu1 %1927, %v639_v61  }
 0x224   :  { %v644_v25 = vmul.f32 1.442695, %v641_v62 }
 0x29d   :  { %v649_v3 = vpop.permute.xlu0 %648 }
 0x29e   :  { %v654_v4 = vrot.slane %v649_v3, %v2058_v2 }
 0x2a0   :  { %v664_v5 = vsub.f32 %v581_v48, %v654_v4 }
 0x2a1   :  { %v658_v6 = vpop.permute.xlu1 %657 }
 0x2a2   :  { %v666_v9 = vmul.f32 1.442695, %v664_v5  ;;  %v663_v10 = vrot.slane %v658_v6, %v2058_v2  ;;  %v685_v6 = vld [vmem:[#allocation4] sm:$0x1] }
 0x2a4   :  { %1928 = vpow2.f32 %v666_v9  ;;  %v665_v11 = vsub.f32 %v613_v50, %v663_v10 }
 0x2a6   :  { %v668_v12 = vmul.f32 1.442695, %v665_v11 }
 0x2a8   :  { %1930 = vpow2.f32 %v668_v12 }
 0x2a9   :  { %1932 = vpow2.f32 %v642_v20 }
 0x2aa   :  { %1934 = vpow2.f32 %v644_v25 }
 0x2ae   :  { %v1929_v14 = vpop.eup %1928 }
 0x2af   :  { %v674_v15 = vsel %vm631_vm1, %v1929_v14, 0.0  ;;  %v709_v16 = vsel %vm707_vm4, %v1929_v14, 0 }
 0x2b0   :  { %675 = vadd.xlane.f32.xlu1 %v674_v15  ;;  %v777_v18 = vand.u32 4294901760, %v709_v16 }
 0x2b2   :  { %v1931_v19 = vpop.eup %1930  ;;  %v778_v21 = vsub.f32 %v709_v16, %v777_v18 }
 0x2b3   :  { %v677_v22 = vsel %vm631_vm1, %v1931_v19, 0.0  ;;  %v1158_v28 = vsel %vm707_vm4, %v1931_v19, 0  ;;  %v1933_v30 = vpop.eup %1932 }
 0x2b4   :  { %678 = vadd.xlane.f32.xlu0 %v677_v22  ;;  %v779_v24 = vand.u32 4294901760, %v778_v21  ;;  %v1226_v31 = vand.u32 4294901760, %v1158_v28  ;;  %v1935_v33 = vpop.eup %1934  ;;  %v672_v41 = vmul.f32 %v1933_v30, %v670_v40 }
 0x2b5   :  { %v673_v45 = vmul.f32 %v1935_v33, %v671_v43 }
 0x2b6   :  { %v780_v7 = vsub.f32 %v778_v21, %v779_v24  ;;  %v1227_v34 = vsub.f32 %v1158_v28, %v1226_v31 }
 0x2b8   :  { %v781_v27 = vand.u32 4294901760, %v780_v7  ;;  %v1228_v36 = vand.u32 4294901760, %v1227_v34 }
 0x2ba   :  { %1805 = vmatmul.mubr.f32.vlgmr.msra.gmra.mrb[0].mxu1 %v781_v27  ;;  %v1229_v37 = vsub.f32 %v1227_v34, %v1228_v36 }
 0x2bb   :  { %1808 = vmatpush3.msra.mxu1 %v792_v26  ;;  %1809 = vmatprep.mubr.msk.f32.mxu1 %vm1967_vm3, %v1966_v54 }
 0x2bc   :  { %1812 = vmatprep.subr.mxu1 %v1966_v54  ;;  %v1230_v39 = vand.u32 4294901760, %v1229_v37 }
 0x2be   :  { %1810 = vmatmul.mubr.f32.vlgmr.msra.gmra.mrb[2].mxu1 %v777_v18 }
 0x2bf   :  { %1813 = vmatpush3.msra.mxu1 %v789_v13  ;;  %1814 = vmatprep.mubr.msk.f32.mxu1 %vm1967_vm3, %v1966_v54 }
 0x2c0   :  { %1817 = vmatprep.subr.mxu1 %v1966_v54 }
 0x2c1   :  { %689 = vperm.xlu1 %1927, %v1933_v30  }
 0x2c2   :  { %1815 = vmatmul.mubr.f32.vlgmr.msra.gmra.mrb[4].mxu1 %v778_v21 }
 0x2c3   :  { %1818 = vmatpush3.msra.mxu1 %v2049_v63  ;;  %1819 = vmatprep.mubr.msk.f32.mxu1 %vm1967_vm3, %v1966_v54 }
 0x2c4   :  { %1822 = vmatprep.subr.mxu1 %v1966_v54 }
 0x2c5   :  { %698 = vperm.xlu1 %1927, %v1935_v33  }
 0x2c6   :  { %1820 = vmatmul.mubr.f32.vlgmr.msra.gmra.mrb[6].mxu1 %v779_v24 }
 0x2c7   :  { %1823 = vmatpush3.msra.mxu1 %v790_v17  ;;  %1824 = vmatprep.mubr.msk.f32.mxu1 %vm1967_vm3, %v1966_v54 }
 0x2c8   :  { %1827 = vmatprep.subr.mxu1 %v1966_v54 }
 0x2ca   :  { %1825 = vmatmul.mubr.f32.vlgmr.msra.gmra.mrb[8].mxu1 %v777_v18 }
 0x2cb   :  { %1828 = vmatpush3.msra.mxu1 %v2049_v63  ;;  %1829 = vmatprep.mubr.msk.f32.mxu1 %vm1967_vm3, %v1966_v54 }
 0x2cc   :  { %1832 = vmatprep.subr.mxu1 %v1966_v54 }
 0x2ce   :  { %1830 = vmatmul.mubr.f32.vlgmr.msra.gmra.mrb[10].mxu1 %v777_v18 }
 0x2cf   :  { %1833 = vmatpush3.msra.mxu1 %v1161_v29  ;;  %1834 = vmatprep.mubr.msk.f32.mxu1 %vm1967_vm3, %v1966_v54 }
 0x2d0   :  { %1837 = vmatprep.subr.mxu1 %v1966_v54 }
 0x2d2   :  { %1835 = vmatmul.mubr.f32.vlgmr.msra.gmra.mrb[12].mxu1 %v1230_v39 }
 0x2d3   :  { %1838 = vmatpush3.msra.mxu1 %v1241_v38  ;;  %1839 = vmatprep.mubr.msk.f32.mxu1 %vm1967_vm3, %v1966_v54 }
 0x2d4   :  { %1842 = vmatprep.subr.mxu1 %v1966_v54 }
 0x2d6   :  { %1840 = vmatmul.mubr.f32.vlgmr.msra.gmra.mrb[14].mxu1 %v1226_v31 }
 0x2d7   :  { %1843 = vmatpush3.msra.mxu1 %v1238_v32  ;;  %1844 = vmatprep.mubr.msk.f32.mxu1 %vm1967_vm3, %v1966_v54 }
 0x2d8   :  { %1847 = vmatprep.subr.mxu1 %v1966_v54 }
 0x2da   :  { %1845 = vmatmul.mubr.f32.vlgmr.msra.gmra.mrb[16].mxu1 %v1227_v34 }
 0x2db   :  { %1848 = vmatpush3.msra.mxu1 %v1161_v29  ;;  %1849 = vmatprep.mubr.msk.f32.mxu1 %vm1967_vm3, %v1966_v54 }
 0x2dc   :  { %1852 = vmatprep.subr.mxu1 %v1966_v54 }
 0x2de   :  { %1850 = vmatmul.mubr.f32.vlgmr.msra.gmra.mrb[18].mxu1 %v1228_v36 }
 0x2df   :  { %1853 = vmatpush3.msra.mxu1 %v1239_v35  ;;  %1854 = vmatprep.mubr.msk.f32.mxu1 %vm1967_vm3, %v1966_v54  ;;  %v1968_v35 = vmov 1966171168  }
 0x2e0   :  { %1857 = vmatprep.subr.mxu1 %v1966_v54  ;;  %v1646_v36 = vunpack.c.l.s4 %v1968_v35 }
 0x2e2   :  { %1855 = vmatmul.mubr.f32.vlgmr.msra.gmra.mrb[20].mxu1 %v1226_v31  ;;  %v1647_v38 = vunpack.c.0.s8 %v1646_v36 }
 0x2e3   :  { %1858 = vmatpush3.msra.mxu1 %v1161_v29  ;;  %1859 = vmatprep.mubr.msk.f32.mxu1 %vm1967_vm3, %v1966_v54  ;;  %v686_v29 = vld [vmem:[#allocation4 + $0x1] sm:$0x1] }
 0x2e6   :  { %1860 = vmatmul.mubr.f32.vlgmr.msra.gmra.mrb[22].mxu1 %v1226_v31 }
 0x33d   :  { %v676_v42 = vpop.xlane.xlu1 %675 }
 0x33e   :  { %v680_v44 = vadd.f32 %v676_v42, %v672_v41 }
 0x340   :  { %683 = vst.msk [vmem:[#allocation3] sm:$0x1] %vm16_vm2, %v680_v44 }
 0x341   :  { %v679_v46 = vpop.xlane.xlu0 %678  ;;  %v690_v63 = vpop.permute.xlu1 %689 }
 0x342   :  { %v681_v47 = vadd.f32 %v679_v46, %v673_v45  ;;  %v695_v3 = vrot.slane %v690_v63, %v2058_v2  ;;  %v1650_v45 = vsub.s32 %v1647_v38, %v2055_v1 }
 0x344   :  { %684 = vst.msk [vmem:[#allocation3 + $0x1] sm:$0x1] %vm16_vm2, %v681_v47  ;;  %v705_v10 = vmul.f32 %v695_v3, %v685_v6 }
 0x345   :  { %v699_v25 = vpop.permute.xlu1 %698 }
 0x346   :  { %v704_v26 = vrot.slane %v699_v25, %v2058_v2 }
 0x347   :  { %v1616_v48 = vld [vmem:[#allocation3] sm:$0x1] }
 0x348   :  { %1936 = vrcp.f32 %v1616_v48  ;;  %v706_v31 = vmul.f32 %v704_v26, %v686_v29 }
 0x34b   :  { %v1617_v49 = vld [vmem:[#allocation3 + $0x1] sm:$0x1] }
 0x34c   :  { %1938 = vrcp.f32 %v1617_v49 }
 0x352   :  { %v1937_v50 = vpop.eup %1936 }
 0x353   :  { %1624 = vperm.xlu0 %1926, %v1937_v50  }
 0x356   :  { %v1939_v51 = vpop.eup %1938 }
 0x357   :  { %1633 = vperm.xlu1 %1927, %v1939_v51  }
 0x38d   :  { %v783_v52 = vpop.f32.mrb[0].mxu1 }
 0x38e   :  { %v1806_v53 = vpop.f32.mrb[1].mxu1 }
 0x391   :  { %v859_v54 = vpop.f32.mrb[2].mxu1 }
 0x392   :  { %v860_v55 = vadd.f32 %v859_v54, %v783_v52  ;;  %v1811_v56 = vpop.f32.mrb[3].mxu1 }
 0x395   :  { %v933_v57 = vpop.f32.mrb[4].mxu1 }
 0x396   :  { %v934_v58 = vadd.f32 %v933_v57, %v860_v55  ;;  %v1816_v59 = vpop.f32.mrb[5].mxu1 }
 0x399   :  { %v1007_v60 = vpop.f32.mrb[6].mxu1 }
 0x39a   :  { %v1008_v61 = vadd.f32 %v1007_v60, %v934_v58  ;;  %v1821_v62 = vpop.f32.mrb[7].mxu1 }
 0x39d   :  { %v1081_v0 = vpop.f32.mrb[8].mxu1 }
 0x39e   :  { %v1082_v4 = vadd.f32 %v1081_v0, %v1008_v61  ;;  %v1826_v5 = vpop.f32.mrb[9].mxu1 }
 0x3a1   :  { %v1153_v9 = vpop.f32.mrb[10].mxu1 }
 0x3a2   :  { %v1154_v11 = vadd.f32 %v1153_v9, %v1082_v4  ;;  %v1831_v12 = vpop.f32.mrb[11].mxu1 }
 0x3a4   :  { %v1606_v13 = vadd.f32 %v1154_v11, %v705_v10 }
 0x3a5   :  { %v1232_v14 = vpop.f32.mrb[12].mxu1 }
 0x3a6   :  { %1609 = vst.msk [vmem:[#allocation4] sm:$0x1] %vm21_vm5, %v1606_v13  ;;  %v1836_v15 = vpop.f32.mrb[13].mxu1 }
 0x3a9   :  { %v1308_v16 = vpop.f32.mrb[14].mxu1 }
 0x3aa   :  { %v1309_v17 = vadd.f32 %v1308_v16, %v1232_v14  ;;  %v1841_v18 = vpop.f32.mrb[15].mxu1 }
 0x3ad   :  { %v1382_v19 = vpop.f32.mrb[16].mxu1  ;;  %v1620_v41 = vld [vmem:[#allocation4] sm:$0x1] }
 0x3ae   :  { %v1383_v20 = vadd.f32 %v1382_v19, %v1309_v17  ;;  %v1846_v21 = vpop.f32.mrb[17].mxu1 }
 0x3b1   :  { %v1456_v22 = vpop.f32.mrb[18].mxu1 }
 0x3b2   :  { %v1457_v23 = vadd.f32 %v1456_v22, %v1383_v20  ;;  %v1851_v24 = vpop.f32.mrb[19].mxu1 }
 0x3b5   :  { %v1530_v7 = vpop.f32.mrb[20].mxu1 }
 0x3b6   :  { %v1531_v27 = vadd.f32 %v1530_v7, %v1457_v23  ;;  %v1856_v28 = vpop.f32.mrb[21].mxu1 }
 0x3b9   :  { %v1602_v30 = vpop.f32.mrb[22].mxu1 }
 0x3ba   :  { %v1603_v32 = vadd.f32 %v1602_v30, %v1531_v27  ;;  %v1861_v33 = vpop.f32.mrb[23].mxu1 }
 0x3bc   :  { %v1607_v34 = vadd.f32 %v1603_v32, %v706_v31 }
 0x3be   :  { %1610 = vst.msk [vmem:[#allocation4 + $0x1] sm:$0x1] %vm21_vm5, %v1607_v34 }
 0x3c5   :  { %v1621_v42 = vld [vmem:[#allocation4 + $0x1] sm:$0x1] }
 0x3d2   :  { %v1625_v8 = vpop.permute.xlu0 %1624 }
 0x3d3   :  { %v1630_v37 = vrot.slane %v1625_v8, %v2058_v2 }
 0x3d5   :  { %v1640_v43 = vmul.f32 %v1630_v37, %v1620_v41 }
 0x3d6   :  { %v1634_v39 = vpop.permute.xlu1 %1633 }
 0x3d7   :  { %v1639_v40 = vrot.slane %v1634_v39, %v2058_v2 }
 0x3d9   :  { %v1641_v44 = vmul.f32 %v1639_v40, %v1621_v42 }
 0x3db   :  { %v1644_v46 = vcombine.low %v1640_v43, %v1641_v44 }
 0x3dd   :  { %v1651_v47 = vrot.slane %v1644_v46, %v1650_v45 }
 0x3df   :  { %v1658_v48 = vrot.slane %v1651_v47, %v1650_v45 }
 0x3e1   :  { %1661 = vst.msk [vmem:[#allocation5] sm:$0x3] %vm1660_vm6, %v1658_v48 }
 0x3e2   :  { %1951 = shalt.err (!%p1948_p4)
}
 0x3e3   :  { %s1952_s24 = scalar_lea.hbm %s2131_s2, 32 }
 0x3e4   :  { %p1953_p5 = scmp.ne.s32.totalorder %s2131_s2, %s1952_s24  ;;  %p1956_p6 = scmp.lt.u32.totalorder %s1952_s24, %s2131_s2 }
 0x3e6   :  { %p1958_p7 = pnand %p1956_p6, %p1953_p5 }
 0x3e8   :  { %1961 = shalt.err (!%p1958_p7)
}
 0x3e9   :  { %1671 = dma.vmem_to_hbm [thread:$0]  %s1669_s1, 32, %s2131_s2, [#allocation6]  }
 0x3ea   :  { %1962 = dma.done.wait [#allocation6], 32  }
 0x3eb   :  { %1963 = vsyncadd [#allocation6], 4294967264 }
 0x3ec   :  { %1675 = vsyncpa [#allocation6], 1 }

</bundles_post_ra>
